<compile_context>
chip_gen: v7x
topology: tpu7x:2x2x1
jax: 0.10.0
libtpu: 0.0.40
codegen_flags: <defaults>
</compile_context>

<pallas_src>
import functools

import jax
import jax.numpy as jnp
from jax.experimental import pallas as pl
from jax.experimental.pallas import tpu as pltpu


def _round_up(v, m):
    return -(-v // m) * m


def _cls_head_kernel(x_ref, w1_ref, b1_ref, w2_ref, b2_ref, o_ref, *, n_sub):
    sub = x_ref.shape[0] // n_sub
    w1 = w1_ref[...]
    b1 = b1_ref[...]          # f32 [1, D]
    w2 = w2_ref[...]
    b2 = b2_ref[...]          # f32 [1, C_pad]
    # Static unroll over batch sub-chunks: the EUP tanh of sub-chunk j can be
    # scheduled under the MXU matmuls of sub-chunk j+1.
    for j in range(n_sub):
        rows = pl.ds(j * sub, sub)
        x = x_ref[rows, :].astype(w1.dtype)           # per-tile cast on the VPU
        h = jnp.dot(x, w1, preferred_element_type=jnp.float32)
        h = jnp.tanh(h + b1)                          # bias add + tanh in f32
        p = jnp.dot(h.astype(w2.dtype), w2, preferred_element_type=jnp.float32)
        o_ref[rows, :] = (p + b2).astype(o_ref.dtype)
    # TODO(synk): dropout is nn.Identity for dropout=0.0 (module default); no RNG path.


def _vmem_limit_bytes(vmem_est):
    try:
        vmem_phys = int(pltpu.get_tpu_info().vmem_capacity_bytes)
    except Exception:
        vmem_phys = 64 * 2**20        # conservative: v7x physical VMEM per TC
    cap = max(vmem_phys - 12 * 2**20, 16 * 2**20)   # leave compiler headroom
    return int(min(max(vmem_est * 5 // 4 + (2 << 20), 16 << 20), cap))


def prepare_usm_head_params(w1_t, b1, w2_t, b2, *, param_dtype=jnp.bfloat16):
    """One-time (init-time) parameter prep: optional bf16 cast, lane-pad the
    class dim to a multiple of 128, biases as f32 row vectors. Hoisted out of
    the per-call path so padded/cast weights are not re-materialized per step."""
    D = w1_t.shape[0]
    C = w2_t.shape[1]
    C_pad = _round_up(max(C, 1), 128)
    if param_dtype is not None:
        w1_t = w1_t.astype(param_dtype)
        w2_t = w2_t.astype(param_dtype)
    w2_p = jnp.pad(w2_t, ((0, 0), (0, C_pad - C)))
    b1_2d = b1.astype(jnp.float32).reshape(1, D)
    b2_p = jnp.pad(b2, (0, C_pad - C)).astype(jnp.float32).reshape(1, C_pad)
    return w1_t, b1_2d, w2_p, b2_p


def usm_classification_head_apply(features, w1_t, b1_2d, w2_p, b2_p, *, block_b=512):
    """features: [B, D]; w1_t: [D, D]; b1_2d: [1, D] f32; w2_p: [D, C_pad];
    b2_p: [1, C_pad] f32. Returns [B, C_pad] (class dim still padded)."""
    B, D = features.shape
    C_pad = w2_p.shape[1]
    out_dtype = features.dtype
    x_item = jnp.dtype(features.dtype).itemsize
    out_item = jnp.dtype(out_dtype).itemsize

    # Batch tile: multiple of the sublane packing of the narrowest streamed
    # dtype; capped so the grid has >= 2 steps when possible (v7x dual-TC).
    row_align = {4: 8, 2: 16, 1: 32}.get(min(x_item, out_item), 8)
    tb = min(block_b, _round_up(B, row_align))
    if B >= 2 * row_align:
        tb = min(tb, _round_up(-(-B // 2), row_align))
    tb = max(tb, row_align)
    n_blocks = -(-B // tb)
    B_pad = n_blocks * tb
    if B_pad != B:
        features = jnp.pad(features, ((0, B_pad - B), (0, 0)))

    # In-body sub-chunking of the batch tile (tanh/MXU overlap).
    n_sub = 1
    for cand in (4, 2):
        if tb % cand == 0 and (tb // cand) % 8 == 0 and tb // cand >= 128:
            n_sub = cand
            break

    res_bytes = (w1_t.size * w1_t.dtype.itemsize + w2_p.size * w2_p.dtype.itemsize
                 + b1_2d.size * 4 + b2_p.size * 4)
    cost = pl.CostEstimate(
        flops=2 * B_pad * D * D + 2 * B_pad * D * C_pad,
        transcendentals=B_pad * D,
        bytes_accessed=(B_pad * D * x_item + res_bytes + B_pad * C_pad * out_item),
    )

    def _build(single_buffer_residents):
        res_kwargs = ({"pipeline_mode": pl.Buffered(1)}
                      if single_buffer_residents else {})
        res_mult = 1 if single_buffer_residents else 2
        # 2x pipelined x/out tiles + resident weights/biases + f32 h scratch.
        vmem_est = (2 * tb * D * x_item + 2 * tb * C_pad * out_item
                    + res_mult * res_bytes + tb * D * 4)
        # TODO(synk): if resident W1+W2 bytes approach the per-generation cap
        # (~40 MiB on v7x), switch to a K-tiled grid axis over D with an f32
        # scratch accumulator instead of keeping W1 fully resident.
        return pl.pallas_call(
            functools.partial(_cls_head_kernel, n_sub=n_sub),
            out_shape=jax.ShapeDtypeStruct((B_pad, C_pad), out_dtype),
            grid_spec=pltpu.PrefetchScalarGridSpec(
                num_scalar_prefetch=0,
                grid=(n_blocks,),
                in_specs=[
                    pl.BlockSpec((tb, D), lambda i: (i, 0)),                   # x (pipelined)
                    pl.BlockSpec((D, D), lambda i: (0, 0), **res_kwargs),      # W1^T (resident)
                    pl.BlockSpec((1, D), lambda i: (0, 0), **res_kwargs),      # b1   (resident)
                    pl.BlockSpec((D, C_pad), lambda i: (0, 0), **res_kwargs),  # W2^T (resident)
                    pl.BlockSpec((1, C_pad), lambda i: (0, 0), **res_kwargs),  # b2   (resident)
                ],
                out_specs=pl.BlockSpec((tb, C_pad), lambda i: (i, 0)),
            ),
            compiler_params=pltpu.CompilerParams(
                dimension_semantics=("parallel",),
                vmem_limit_bytes=_vmem_limit_bytes(vmem_est)),
            cost_estimate=cost,
        )

    args = (features, w1_t, b1_2d, w2_p, b2_p)
    try:
        out = _build(True)(*args)
    except Exception:
        # pipeline_mode=pl.Buffered(1) unsupported in this build: fall back to
        # default double-buffering of the resident operands (correctness
        # identical; only costs extra VMEM).
        out = _build(False)(*args)
    return out[:B]


def usm_classification_head(features, w1_t, b1, w2_t, b2, *,
                            block_b=512, param_dtype=jnp.bfloat16):
    """features: [B, D]; w1_t = W1^T: [D, D]; b1: [D]; w2_t = W2^T: [D, C]; b2: [C]."""
    C = w2_t.shape[1]
    params = prepare_usm_head_params(w1_t, b1, w2_t, b2, param_dtype=param_dtype)
    out = usm_classification_head_apply(features, *params, block_b=block_b)
    return out[:, :C]


def _reference(features, w1_t, b1, w2_t, b2):
    """Pure-JAX reference matching the kernel's dtype handling."""
    h = jnp.dot(features.astype(w1_t.dtype), w1_t,
                preferred_element_type=jnp.float32) + b1.astype(jnp.float32)
    h = jnp.tanh(h)
    out = jnp.dot(h.astype(w2_t.dtype), w2_t,
                  preferred_element_type=jnp.float32) + b2.astype(jnp.float32)
    return out


if __name__ == "__main__":
    key = jax.random.PRNGKey(0)
    k_x, k_w1, k_b1, k_w2, k_b2, k_x2 = jax.random.split(key, 6)

    # --- Case 1: tiny module-like shapes, f32 params (tight tolerance). ---
    B, D, C = 8, 32, 2
    features = jax.random.normal(k_x, (B, D), dtype=jnp.float32)
    bound = 1.0 / float(D) ** 0.5
    w1_t = jax.random.uniform(k_w1, (D, D), minval=-bound, maxval=bound, dtype=jnp.float32)
    b1 = jax.random.uniform(k_b1, (D,), minval=-bound, maxval=bound, dtype=jnp.float32)
    w2_t = jax.random.uniform(k_w2, (D, C), minval=-bound, maxval=bound, dtype=jnp.float32)
    b2 = jax.random.uniform(k_b2, (C,), minval=-bound, maxval=bound, dtype=jnp.float32)

    out = jax.block_until_ready(
        usm_classification_head(features, w1_t, b1, w2_t, b2, param_dtype=None))
    ref = _reference(features, w1_t, b1, w2_t, b2)
    assert out.shape == (B, C), out.shape
    assert jnp.allclose(out, ref, atol=1e-5, rtol=1e-5), (
        f"max err {float(jnp.max(jnp.abs(out - ref)))}")

    # --- Case 2: multi-step grid (2 steps, sub-chunked tile) + bf16 weights. ---
    B2, D2 = 512, 128
    feats2 = jax.random.normal(k_x2, (B2, D2), dtype=jnp.float32)
    bound2 = 1.0 / float(D2) ** 0.5
    w1b = jax.random.uniform(k_w1, (D2, D2), minval=-bound2, maxval=bound2, dtype=jnp.float32)
    b1b = jax.random.uniform(k_b1, (D2,), minval=-bound2, maxval=bound2, dtype=jnp.float32)
    w2b = jax.random.uniform(k_w2, (D2, C), minval=-bound2, maxval=bound2, dtype=jnp.float32)
    b2b = jax.random.uniform(k_b2, (C,), minval=-bound2, maxval=bound2, dtype=jnp.float32)

    out2 = jax.block_until_ready(
        usm_classification_head(feats2, w1b, b1b, w2b, b2b,
                                block_b=512, param_dtype=jnp.bfloat16))
    ref2 = _reference(feats2, w1b.astype(jnp.bfloat16), b1b,
                      w2b.astype(jnp.bfloat16), b2b)
    assert out2.shape == (B2, C), out2.shape
    assert jnp.allclose(out2, ref2.astype(out2.dtype), atol=2e-2, rtol=2e-2), (
        f"max err {float(jnp.max(jnp.abs(out2 - ref2.astype(out2.dtype))))}")

    print("KERNEL_OK")
</pallas_src>

<mosaic_0001>
module attributes {stable_mosaic.version = 11 : i64} {
  func.func @_cls_head_kernel(%arg0: i32, %arg1: memref<8x32xf32, #tpu.memory_space<vmem>>, %arg2: memref<32x32xf32, #tpu.memory_space<vmem>>, %arg3: memref<1x32xf32, #tpu.memory_space<vmem>>, %arg4: memref<32x128xf32, #tpu.memory_space<vmem>>, %arg5: memref<1x128xf32, #tpu.memory_space<vmem>>, %arg6: memref<8x128xf32, #tpu.memory_space<vmem>>) attributes {dimension_semantics = [#tpu.dimension_semantics<parallel>], iteration_bounds = array<i64: 1>, scalar_prefetch = 0 : i64, scratch_operands = 0 : i64, tpu.core_type = #tpu.core_type<tc>, window_params = [{transform_indices = @transform_0, window_bounds = array<i64: 8, 32>}, {pipeline_mode = #tpu.pipeline_mode<synchronous>, transform_indices = @transform_1, window_bounds = array<i64: 32, 32>}, {pipeline_mode = #tpu.pipeline_mode<synchronous>, transform_indices = @transform_2, window_bounds = array<i64: 1, 32>}, {pipeline_mode = #tpu.pipeline_mode<synchronous>, transform_indices = @transform_3, window_bounds = array<i64: 32, 128>}, {pipeline_mode = #tpu.pipeline_mode<synchronous>, transform_indices = @transform_4, window_bounds = array<i64: 1, 128>}, {transform_indices = @transform_5, window_bounds = array<i64: 8, 128>}]} {
    %c0 = arith.constant 0 : index
    %c0_0 = arith.constant 0 : index
    %0 = vector.load %arg2[%c0, %c0_0] : memref<32x32xf32, #tpu.memory_space<vmem>>, vector<32x32xf32>
    %c0_1 = arith.constant 0 : index
    %c0_2 = arith.constant 0 : index
    %1 = vector.load %arg3[%c0_1, %c0_2] : memref<1x32xf32, #tpu.memory_space<vmem>>, vector<1x32xf32>
    %c0_3 = arith.constant 0 : index
    %c0_4 = arith.constant 0 : index
    %2 = vector.load %arg4[%c0_3, %c0_4] : memref<32x128xf32, #tpu.memory_space<vmem>>, vector<32x128xf32>
    %c0_5 = arith.constant 0 : index
    %c0_6 = arith.constant 0 : index
    %3 = vector.load %arg5[%c0_5, %c0_6] : memref<1x128xf32, #tpu.memory_space<vmem>>, vector<1x128xf32>
    %c0_7 = arith.constant 0 : index
    %c0_8 = arith.constant 0 : index
    %4 = vector.load %arg1[%c0_7, %c0_8] : memref<8x32xf32, #tpu.memory_space<vmem>>, vector<8x32xf32>
    %cst = arith.constant dense<0.000000e+00> : vector<8x32xf32>
    %5 = tpu.matmul %4, %0, %cst {dimension_numbers = #tpu.dot_dimension_numbers<[1], [0], [0], [1], [0, 0, 1, 1], [], []>} : vector<8x32xf32>, vector<32x32xf32>, vector<8x32xf32> -> vector<8x32xf32>
    %6 = vector.broadcast %1 : vector<1x32xf32> to vector<8x32xf32>
    %7 = arith.addf %5, %6 : vector<8x32xf32>
    %8 = math.tanh %7 : vector<8x32xf32>
    %cst_9 = arith.constant dense<0.000000e+00> : vector<8x128xf32>
    %9 = tpu.matmul %8, %2, %cst_9 {dimension_numbers = #tpu.dot_dimension_numbers<[1], [0], [0], [1], [0, 0, 1, 1], [], []>} : vector<8x32xf32>, vector<32x128xf32>, vector<8x128xf32> -> vector<8x128xf32>
    %10 = vector.broadcast %3 : vector<1x128xf32> to vector<8x128xf32>
    %11 = arith.addf %9, %10 : vector<8x128xf32>
    %c0_10 = arith.constant 0 : index
    %c0_11 = arith.constant 0 : index
    %12 = vector.load %arg6[%c0_10, %c0_11] : memref<8x128xf32, #tpu.memory_space<vmem>>, vector<8x128xf32>
    tpu.vector_store %arg6[%c0_10, %c0_11], %11 {strides = array<i32>} : memref<8x128xf32, #tpu.memory_space<vmem>>, vector<8x128xf32>,
    return
  }
  func.func @transform_0(%arg0: i32) -> (i32, i32) {
    %c0_i32 = arith.constant 0 : i32
    %c0_i32_0 = arith.constant 0 : i32
    return %arg0, %c0_i32 : i32, i32
  }
  func.func @transform_1(%arg0: i32) -> (i32, i32) {
    %c0_i32 = arith.constant 0 : i32
    %c0_i32_0 = arith.constant 0 : i32
    %c0_i32_1 = arith.constant 0 : i32
    return %c0_i32, %c0_i32_0 : i32, i32
  }
  func.func @transform_2(%arg0: i32) -> (i32, i32) {
    %c0_i32 = arith.constant 0 : i32
    %c0_i32_0 = arith.constant 0 : i32
    %c0_i32_1 = arith.constant 0 : i32
    return %c0_i32, %c0_i32_0 : i32, i32
  }
  func.func @transform_3(%arg0: i32) -> (i32, i32) {
    %c0_i32 = arith.constant 0 : i32
    %c0_i32_0 = arith.constant 0 : i32
    %c0_i32_1 = arith.constant 0 : i32
    return %c0_i32, %c0_i32_0 : i32, i32
  }
  func.func @transform_4(%arg0: i32) -> (i32, i32) {
    %c0_i32 = arith.constant 0 : i32
    %c0_i32_0 = arith.constant 0 : i32
    %c0_i32_1 = arith.constant 0 : i32
    return %c0_i32, %c0_i32_0 : i32, i32
  }
  func.func @transform_5(%arg0: i32) -> (i32, i32) {
    %c0_i32 = arith.constant 0 : i32
    %c0_i32_0 = arith.constant 0 : i32
    return %arg0, %c0_i32 : i32, i32
  }
}

module attributes {stable_mosaic.version = 11 : i64} {
  func.func @_cls_head_kernel(%arg0: i32, %arg1: memref<8x32xf32, #tpu.memory_space<vmem>>, %arg2: memref<32x32xf32, #tpu.memory_space<vmem>>, %arg3: memref<1x32xf32, #tpu.memory_space<vmem>>, %arg4: memref<32x128xf32, #tpu.memory_space<vmem>>, %arg5: memref<1x128xf32, #tpu.memory_space<vmem>>, %arg6: memref<8x128xf32, #tpu.memory_space<vmem>>) attributes {dimension_semantics = [#tpu.dimension_semantics<parallel>], iteration_bounds = array<i64: 1>, scalar_prefetch = 0 : i64, scratch_operands = 0 : i64, tpu.core_type = #tpu.core_type<tc>, window_params = [{transform_indices = @transform_0, window_bounds = array<i64: 8, 32>}, {pipeline_mode = #tpu.pipeline_mode<synchronous>, transform_indices = @transform_1, window_bounds = array<i64: 32, 32>}, {pipeline_mode = #tpu.pipeline_mode<synchronous>, transform_indices = @transform_2, window_bounds = array<i64: 1, 32>}, {pipeline_mode = #tpu.pipeline_mode<synchronous>, transform_indices = @transform_3, window_bounds = array<i64: 32, 128>}, {pipeline_mode = #tpu.pipeline_mode<synchronous>, transform_indices = @transform_4, window_bounds = array<i64: 1, 128>}, {transform_indices = @transform_5, window_bounds = array<i64: 8, 128>}]} {
    %c0 = arith.constant 0 : index
    %c0_0 = arith.constant 0 : index
    %0 = vector.load %arg2[%c0, %c0_0] : memref<32x32xf32, #tpu.memory_space<vmem>>, vector<32x32xf32>
    %c0_1 = arith.constant 0 : index
    %c0_2 = arith.constant 0 : index
    %1 = vector.load %arg3[%c0_1, %c0_2] : memref<1x32xf32, #tpu.memory_space<vmem>>, vector<1x32xf32>
    %c0_3 = arith.constant 0 : index
    %c0_4 = arith.constant 0 : index
    %2 = vector.load %arg4[%c0_3, %c0_4] : memref<32x128xf32, #tpu.memory_space<vmem>>, vector<32x128xf32>
    %c0_5 = arith.constant 0 : index
    %c0_6 = arith.constant 0 : index
    %3 = vector.load %arg5[%c0_5, %c0_6] : memref<1x128xf32, #tpu.memory_space<vmem>>, vector<1x128xf32>
    %c0_7 = arith.constant 0 : index
    %c0_8 = arith.constant 0 : index
    %4 = vector.load %arg1[%c0_7, %c0_8] : memref<8x32xf32, #tpu.memory_space<vmem>>, vector<8x32xf32>
    %cst = arith.constant dense<0.000000e+00> : vector<8x32xf32>
    %5 = tpu.matmul %4, %0, %cst {dimension_numbers = #tpu.dot_dimension_numbers<[1], [0], [0], [1], [0, 0, 1, 1], [], []>} : vector<8x32xf32>, vector<32x32xf32>, vector<8x32xf32> -> vector<8x32xf32>
    %6 = vector.broadcast %1 : vector<1x32xf32> to vector<8x32xf32>
    %7 = arith.addf %5, %6 : vector<8x32xf32>
    %8 = math.tanh %7 : vector<8x32xf32>
    %cst_9 = arith.constant dense<0.000000e+00> : vector<8x128xf32>
    %9 = tpu.matmul %8, %2, %cst_9 {dimension_numbers = #tpu.dot_dimension_numbers<[1], [0], [0], [1], [0, 0, 1, 1], [], []>} : vector<8x32xf32>, vector<32x128xf32>, vector<8x128xf32> -> vector<8x128xf32>
    %10 = vector.broadcast %3 : vector<1x128xf32> to vector<8x128xf32>
    %11 = arith.addf %9, %10 : vector<8x128xf32>
    %c0_10 = arith.constant 0 : index
    %c0_11 = arith.constant 0 : index
    %12 = vector.load %arg6[%c0_10, %c0_11] : memref<8x128xf32, #tpu.memory_space<vmem>>, vector<8x128xf32>
    tpu.vector_store %arg6[%c0_10, %c0_11], %11 {strides = array<i32>} : memref<8x128xf32, #tpu.memory_space<vmem>>, vector<8x128xf32>,
    return
  }
  func.func @transform_0(%arg0: i32) -> (i32, i32) {
    %c0_i32 = arith.constant 0 : i32
    %c0_i32_0 = arith.constant 0 : i32
    return %arg0, %c0_i32 : i32, i32
  }
  func.func @transform_1(%arg0: i32) -> (i32, i32) {
    %c0_i32 = arith.constant 0 : i32
    %c0_i32_0 = arith.constant 0 : i32
    %c0_i32_1 = arith.constant 0 : i32
    return %c0_i32, %c0_i32_0 : i32, i32
  }
  func.func @transform_2(%arg0: i32) -> (i32, i32) {
    %c0_i32 = arith.constant 0 : i32
    %c0_i32_0 = arith.constant 0 : i32
    %c0_i32_1 = arith.constant 0 : i32
    return %c0_i32, %c0_i32_0 : i32, i32
  }
  func.func @transform_3(%arg0: i32) -> (i32, i32) {
    %c0_i32 = arith.constant 0 : i32
    %c0_i32_0 = arith.constant 0 : i32
    %c0_i32_1 = arith.constant 0 : i32
    return %c0_i32, %c0_i32_0 : i32, i32
  }
  func.func @transform_4(%arg0: i32) -> (i32, i32) {
    %c0_i32 = arith.constant 0 : i32
    %c0_i32_0 = arith.constant 0 : i32
    %c0_i32_1 = arith.constant 0 : i32
    return %c0_i32, %c0_i32_0 : i32, i32
  }
  func.func @transform_5(%arg0: i32) -> (i32, i32) {
    %c0_i32 = arith.constant 0 : i32
    %c0_i32_0 = arith.constant 0 : i32
    return %arg0, %c0_i32 : i32, i32
  }
}

</mosaic_0001>

<bundles_post_ra>
// kernel: tpu_custom_call.1
= control target key start
LH: loop header
LB: loop body
LE: loop exit
PB: predicated region body
PF: predicated region fallthrough
CT: control target
= control target key end

     0   :  { %10 = vsyncpa [#allocation3], 0  ;;  %s502_s0 = inlined_call_operand.hbm [shape: f32[8,32], index: 0, kind: input, shape index: {}]   ;;  %s503_s1 = inlined_call_operand.hbm [shape: f32[32,32], index: 1, kind: input, shape index: {}]   ;;  %s504_s2 = inlined_call_operand.vmem [shape: f32[1,32], index: 2, kind: input, shape index: {}]   ;;  %s505_s3 = inlined_call_operand.hbm [shape: f32[32,128], index: 3, kind: input, shape index: {}]   ;;  %s506_s4 = inlined_call_operand.vmem [shape: f32[1,128], index: 4, kind: input, shape index: {}]   ;;  %s507_s5 = inlined_call_operand.hbm [shape: f32[8,128], index: 5, kind: output, shape index: {}]  }
   0x1   :  { %11 = vsyncpa [#allocation6], 0 }
   0x2   :  { %12 = vsyncpa [#allocation4], 0  ;;  %s401_s18 = smov [#allocation5]   ;;  %s307_s22 = scalar_lea.hbm %s503_s1, 512 }
   0x3   :  { %s28_s19 = sshll.u32 %s401_s18, 4  ;;  %p308_p0 = scmp.ne.s32.totalorder %s503_s1, %s307_s22  ;;  %s29_s19 = int_to_ptr.vmem [resolvable:$true] %s28_s19 }
   0x4   :  { %p311_p1 = scmp.lt.u32.totalorder %s307_s22, %s503_s1 }
   0x6   :  { %p313_p2 = pnand %p311_p1, %p308_p0 }
   0x8   :  { %316 = shalt.err (!%p313_p2)
}
   0x9   :  { %s317_s27 = scalar_lea.vmem %s29_s19, 512  ;;  %p322_p4 = scmp.lt.s32.totalorder %s29_s19, %s29_s19 }
   0xa   :  { %p318_p3 = scmp.ne.s32.totalorder %s29_s19, %s317_s27  ;;  %p323_p5 = scmp.lt.s32.totalorder %s317_s27, %s317_s27 }
   0xc   :  { %p324_p6 = por %p323_p5, %p322_p4 }
   0xe   :  { %p325_p7 = pnand %p324_p6, %p318_p3 }
  0x10   :  { %328 = shalt.err (!%p325_p7)
}
  0x11   :  { %s402_s28 = smov 128   ;;  %s403_s29 = smov 8  }
  0x12   :  { %34 = dma.hbm_to_vmem [thread:$0]  %s503_s1, 512, %s29_s19, [#allocation6], %s402_s28, %s402_s28, %s403_s29  }
  0x13   :  { %s404_s7 = smov [#allocation2]   ;;  %s405_s9 = smov [#allocation7]  }
  0x14   :  { %s19_s8 = sshll.u32 %s404_s7, 4  ;;  %s42_s10 = sshll.u32 %s405_s9, 4  ;;  %s20_s8 = int_to_ptr.vmem [resolvable:$true] %s19_s8  ;;  %s43_s10 = int_to_ptr.vmem [resolvable:$true] %s42_s10 }
  0x15   :  { %s329_s13 = scalar_lea.hbm %s502_s0, 128 }
  0x16   :  { %p330_p8 = scmp.ne.s32.totalorder %s502_s0, %s329_s13  ;;  %p333_p9 = scmp.lt.u32.totalorder %s329_s13, %s502_s0 }
  0x18   :  { %p335_p10 = pnand %p333_p9, %p330_p8 }
  0x1a   :  { %338 = shalt.err (!%p335_p10)
}
  0x1b   :  { %s339_s1 = scalar_lea.vmem %s20_s8, 128  ;;  %p344_p12 = scmp.lt.s32.totalorder %s20_s8, %s20_s8 }
  0x1c   :  { %p340_p11 = scmp.ne.s32.totalorder %s20_s8, %s339_s1  ;;  %p345_p13 = scmp.lt.s32.totalorder %s339_s1, %s339_s1 }
  0x1e   :  { %p346_p0 = por %p345_p13, %p344_p12 }
  0x20   :  { %p347_p1 = pnand %p346_p0, %p340_p11 }
  0x22   :  { %350 = shalt.err (!%p347_p1)
}
  0x23   :  { %22 = dma.hbm_to_vmem [thread:$0]  %s502_s0, 128, %s20_s8, [#allocation3]  }
  0x24   :  { %s351_s22 = scalar_lea.hbm %s505_s3, 512 }
  0x25   :  { %p352_p2 = scmp.ne.s32.totalorder %s505_s3, %s351_s22  ;;  %p355_p3 = scmp.lt.u32.totalorder %s351_s22, %s505_s3 }
  0x27   :  { %p357_p4 = pnand %p355_p3, %p352_p2 }
  0x29   :  { %360 = shalt.err (!%p357_p4)
}
  0x2a   :  { %s361_s27 = scalar_lea.vmem %s43_s10, 512  ;;  %p366_p6 = scmp.lt.s32.totalorder %s43_s10, %s43_s10 }
  0x2b   :  { %p362_p5 = scmp.ne.s32.totalorder %s43_s10, %s361_s27  ;;  %p367_p7 = scmp.lt.s32.totalorder %s361_s27, %s361_s27 }
  0x2d   :  { %p368_p8 = por %p367_p7, %p366_p6 }
  0x2f   :  { %p369_p9 = pnand %p368_p8, %p362_p5 }
  0x31   :  { %372 = shalt.err (!%p369_p9)
}
  0x32   :  { %48 = dma.hbm_to_vmem [thread:$0]  %s505_s3, 512, %s43_s10, [#allocation6], %s402_s28, %s402_s28, %s403_s29  }
  0x33   :  { %395 = dma.done.wait [#allocation3], 128  }
  0x34   :  { %396 = vsyncadd [#allocation3], 4294967168 }
  0x35   :  { %397 = dma.done.wait [#allocation6], 1024  }
  0x36   :  { %398 = vsyncadd [#allocation6], 4294966272  ;;  %v406_v0 = vmov 0.0|0.0   ;;  %vm407_vm0 = vmmov 0   ;;  %v408_v1 = vmov 0.0   ;;  %v60_v2 = vld [vmem:[#allocation5] sm:$0xff] }
  0x37   :  { %284 = vmatprep.subr.bf16.mxu0 %v406_v0  ;;  %270 = vmatprep.mubr.msk.f32.mxu0 %vm407_vm0, %v408_v1  ;;  %v61_v3 = vld [vmem:[#allocation5 + $0x8] sm:$0xff]  ;;  %v62_v4 = vld [vmem:[#allocation5 + $0x10] sm:$0xff]  ;;  %v63_v6 = vld [vmem:[#allocation5 + $0x18] sm:$0xff]  ;;  %vm77_vm1 = vcmask 261120   ;;  %s409_s7 = smov [#allocation8]  }
  0x38   :  { %290 = vmatprep.subr.bf16.mxu1 %v406_v0  ;;  %281 = vmatprep.mubr.msk.f32.mxu1 %vm407_vm0, %v408_v1  ;;  %v285_v5 = vpack.c.bf16 %v61_v3, %v60_v2  ;;  %v288_v7 = vpack.c.bf16 %v63_v6, %v62_v4  ;;  %v70_v8 = vld [vmem:[#allocation2] sm:$0xff]  ;;  %v65_v9 = vld [vmem:[#allocation7] sm:$0xff]  ;;  %v66_v10 = vld [vmem:[#allocation7 + $0x8] sm:$0xff]  ;;  %s238_s8 = sshll.u32 %s409_s7, 4  ;;  %s239_s8 = int_to_ptr.vmem [resolvable:$true] %s238_s8 }
  0x39   :  { %v67_v11 = vld [vmem:[#allocation7 + $0x10] sm:$0xff]  ;;  %v291_v12 = vpack.c.bf16 %v66_v10, %v65_v9  ;;  %v68_v13 = vld [vmem:[#allocation7 + $0x18] sm:$0xff]  ;;  %s373_s9 = scalar_lea.vmem %s239_s8, 128  ;;  %p378_p11 = scmp.lt.s32.totalorder %s239_s8, %s239_s8 }
  0x3a   :  { %286 = vmatpush3.bf16.msra.mxu0 %v285_v5  ;;  %v294_v14 = vpack.c.bf16 %v68_v13, %v67_v11  ;;  %v248_v15 = vld [vmem:[%s504_s2] ss:$0 sm:$0xff]  ;;  %p374_p10 = scmp.ne.s32.totalorder %s239_s8, %s373_s9  ;;  %p379_p12 = scmp.lt.s32.totalorder %s373_s9, %s373_s9 }
  0x3b   :  { %287 = vmatprep.subr.bf16.mxu0 %v406_v0  ;;  %292 = vmatpush3.bf16.msra.mxu1 %v291_v12  ;;  %v250_v20 = vld [vmem:[%s506_s4] ss:$0 sm:$0xff] }
  0x3c   :  { %293 = vmatprep.subr.bf16.mxu1 %v406_v0  ;;  %p380_p13 = por %p379_p12, %p378_p11 }
  0x3e   :  { %289 = vmatpush3.bf16.msra.mxu0 %v288_v7  ;;  %p381_p0 = pnand %p380_p13, %p374_p10 }
  0x3f   :  { %295 = vmatpush3.bf16.msra.mxu1 %v294_v14 }
  0x41   :  { %271 = vmatmul.mubr.msk.f32.vlgmr.msra.gmra.mrb[0].mxu0 %vm77_vm1, %v70_v8 }
 0x114   :  { %v147_v16 = vpop.f32.mrb[0].mxu0 }
 0x115   :  { %v148_v17 = vadd.f32 %v248_v15, %v147_v16  ;;  %v272_v18 = vpop.f32.mrb[1].mxu0 }
 0x117   :  { %305 = vtanh.f32 %v148_v17 }
 0x121   :  { %v306_v19 = vpop.eup %305 }
 0x122   :  { %282 = vmatmul.mubr.msk.f32.vlgmr.msra.gmra.mrb[0].mxu1 %vm77_vm1, %v306_v19 }
 0x1f5   :  { %v227_v21 = vpop.f32.mrb[0].mxu1 }
 0x1f6   :  { %v228_v22 = vadd.f32 %v250_v20, %v227_v21  ;;  %v283_v23 = vpop.f32.mrb[1].mxu1 }
 0x1f8   :  { %231 = vst [vmem:[#allocation8] sm:$0xff] %v228_v22 }
 0x1f9   :  { %384 = shalt.err (!%p381_p0)
}
 0x1fa   :  { %s385_s11 = scalar_lea.hbm %s507_s5, 128 }
 0x1fb   :  { %p386_p1 = scmp.ne.s32.totalorder %s507_s5, %s385_s11  ;;  %p389_p2 = scmp.lt.u32.totalorder %s385_s11, %s507_s5 }
 0x1fd   :  { %p391_p3 = pnand %p389_p2, %p386_p1 }
 0x1ff   :  { %394 = shalt.err (!%p391_p3)
}
 0x200   :  { %241 = dma.vmem_to_hbm [thread:$0]  %s239_s8, 128, %s507_s5, [#allocation4]  }
 0x201   :  { %399 = dma.done.wait [#allocation4], 128  }
 0x202   :  { %400 = vsyncadd [#allocation4], 4294967168 }
 0x203   :  { %245 = vsyncpa [#allocation3], 1 }
 0x204   :  { %246 = vsyncpa [#allocation6], 1 }
 0x205   :  { %247 = vsyncpa [#allocation4], 1 }

// kernel: tpu_custom_call.1
= control target key start
LH: loop header
LB: loop body
LE: loop exit
PB: predicated region body
PF: predicated region fallthrough
CT: control target
= control target key end

     0   :  { %10 = vsyncpa [#allocation3], 0  ;;  %s502_s0 = inlined_call_operand.hbm [shape: f32[8,32], index: 0, kind: input, shape index: {}]   ;;  %s503_s1 = inlined_call_operand.hbm [shape: f32[32,32], index: 1, kind: input, shape index: {}]   ;;  %s504_s2 = inlined_call_operand.vmem [shape: f32[1,32], index: 2, kind: input, shape index: {}]   ;;  %s505_s3 = inlined_call_operand.hbm [shape: f32[32,128], index: 3, kind: input, shape index: {}]   ;;  %s506_s4 = inlined_call_operand.vmem [shape: f32[1,128], index: 4, kind: input, shape index: {}]   ;;  %s507_s5 = inlined_call_operand.hbm [shape: f32[8,128], index: 5, kind: output, shape index: {}]  }
   0x1   :  { %11 = vsyncpa [#allocation6], 0 }
   0x2   :  { %12 = vsyncpa [#allocation4], 0  ;;  %s401_s18 = smov [#allocation5]   ;;  %s307_s22 = scalar_lea.hbm %s503_s1, 512 }
   0x3   :  { %s28_s19 = sshll.u32 %s401_s18, 4  ;;  %p308_p0 = scmp.ne.s32.totalorder %s503_s1, %s307_s22  ;;  %s29_s19 = int_to_ptr.vmem [resolvable:$true] %s28_s19 }
   0x4   :  { %p311_p1 = scmp.lt.u32.totalorder %s307_s22, %s503_s1 }
   0x6   :  { %p313_p2 = pnand %p311_p1, %p308_p0 }
   0x8   :  { %316 = shalt.err (!%p313_p2)
}
   0x9   :  { %s317_s27 = scalar_lea.vmem %s29_s19, 512  ;;  %p322_p4 = scmp.lt.s32.totalorder %s29_s19, %s29_s19 }
   0xa   :  { %p318_p3 = scmp.ne.s32.totalorder %s29_s19, %s317_s27  ;;  %p323_p5 = scmp.lt.s32.totalorder %s317_s27, %s317_s27 }
   0xc   :  { %p324_p6 = por %p323_p5, %p322_p4 }
   0xe   :  { %p325_p7 = pnand %p324_p6, %p318_p3 }
  0x10   :  { %328 = shalt.err (!%p325_p7)
}
  0x11   :  { %s402_s28 = smov 128   ;;  %s403_s29 = smov 8  }
  0x12   :  { %34 = dma.hbm_to_vmem [thread:$0]  %s503_s1, 512, %s29_s19, [#allocation6], %s402_s28, %s402_s28, %s403_s29  }
  0x13   :  { %s404_s7 = smov [#allocation2]   ;;  %s405_s9 = smov [#allocation7]  }
  0x14   :  { %s19_s8 = sshll.u32 %s404_s7, 4  ;;  %s42_s10 = sshll.u32 %s405_s9, 4  ;;  %s20_s8 = int_to_ptr.vmem [resolvable:$true] %s19_s8  ;;  %s43_s10 = int_to_ptr.vmem [resolvable:$true] %s42_s10 }
  0x15   :  { %s329_s13 = scalar_lea.hbm %s502_s0, 128 }
  0x16   :  { %p330_p8 = scmp.ne.s32.totalorder %s502_s0, %s329_s13  ;;  %p333_p9 = scmp.lt.u32.totalorder %s329_s13, %s502_s0 }
  0x18   :  { %p335_p10 = pnand %p333_p9, %p330_p8 }
  0x1a   :  { %338 = shalt.err (!%p335_p10)
}
  0x1b   :  { %s339_s1 = scalar_lea.vmem %s20_s8, 128  ;;  %p344_p12 = scmp.lt.s32.totalorder %s20_s8, %s20_s8 }
  0x1c   :  { %p340_p11 = scmp.ne.s32.totalorder %s20_s8, %s339_s1  ;;  %p345_p13 = scmp.lt.s32.totalorder %s339_s1, %s339_s1 }
  0x1e   :  { %p346_p0 = por %p345_p13, %p344_p12 }
  0x20   :  { %p347_p1 = pnand %p346_p0, %p340_p11 }
  0x22   :  { %350 = shalt.err (!%p347_p1)
}
  0x23   :  { %22 = dma.hbm_to_vmem [thread:$0]  %s502_s0, 128, %s20_s8, [#allocation3]  }
  0x24   :  { %s351_s22 = scalar_lea.hbm %s505_s3, 512 }
  0x25   :  { %p352_p2 = scmp.ne.s32.totalorder %s505_s3, %s351_s22  ;;  %p355_p3 = scmp.lt.u32.totalorder %s351_s22, %s505_s3 }
  0x27   :  { %p357_p4 = pnand %p355_p3, %p352_p2 }
  0x29   :  { %360 = shalt.err (!%p357_p4)
}
  0x2a   :  { %s361_s27 = scalar_lea.vmem %s43_s10, 512  ;;  %p366_p6 = scmp.lt.s32.totalorder %s43_s10, %s43_s10 }
  0x2b   :  { %p362_p5 = scmp.ne.s32.totalorder %s43_s10, %s361_s27  ;;  %p367_p7 = scmp.lt.s32.totalorder %s361_s27, %s361_s27 }
  0x2d   :  { %p368_p8 = por %p367_p7, %p366_p6 }
  0x2f   :  { %p369_p9 = pnand %p368_p8, %p362_p5 }
  0x31   :  { %372 = shalt.err (!%p369_p9)
}
  0x32   :  { %48 = dma.hbm_to_vmem [thread:$0]  %s505_s3, 512, %s43_s10, [#allocation6], %s402_s28, %s402_s28, %s403_s29  }
  0x33   :  { %395 = dma.done.wait [#allocation3], 128  }
  0x34   :  { %396 = vsyncadd [#allocation3], 4294967168 }
  0x35   :  { %397 = dma.done.wait [#allocation6], 1024  }
  0x36   :  { %398 = vsyncadd [#allocation6], 4294966272  ;;  %v406_v0 = vmov 0.0|0.0   ;;  %vm407_vm0 = vmmov 0   ;;  %v408_v1 = vmov 0.0   ;;  %v60_v2 = vld [vmem:[#allocation5] sm:$0xff] }
  0x37   :  { %284 = vmatprep.subr.bf16.mxu0 %v406_v0  ;;  %270 = vmatprep.mubr.msk.f32.mxu0 %vm407_vm0, %v408_v1  ;;  %v61_v3 = vld [vmem:[#allocation5 + $0x8] sm:$0xff]  ;;  %v62_v4 = vld [vmem:[#allocation5 + $0x10] sm:$0xff]  ;;  %v63_v6 = vld [vmem:[#allocation5 + $0x18] sm:$0xff]  ;;  %vm77_vm1 = vcmask 261120   ;;  %s409_s7 = smov [#allocation8]  }
  0x38   :  { %290 = vmatprep.subr.bf16.mxu1 %v406_v0  ;;  %281 = vmatprep.mubr.msk.f32.mxu1 %vm407_vm0, %v408_v1  ;;  %v285_v5 = vpack.c.bf16 %v61_v3, %v60_v2  ;;  %v288_v7 = vpack.c.bf16 %v63_v6, %v62_v4  ;;  %v70_v8 = vld [vmem:[#allocation2] sm:$0xff]  ;;  %v65_v9 = vld [vmem:[#allocation7] sm:$0xff]  ;;  %v66_v10 = vld [vmem:[#allocation7 + $0x8] sm:$0xff]  ;;  %s238_s8 = sshll.u32 %s409_s7, 4  ;;  %s239_s8 = int_to_ptr.vmem [resolvable:$true] %s238_s8 }
  0x39   :  { %v67_v11 = vld [vmem:[#allocation7 + $0x10] sm:$0xff]  ;;  %v291_v12 = vpack.c.bf16 %v66_v10, %v65_v9  ;;  %v68_v13 = vld [vmem:[#allocation7 + $0x18] sm:$0xff]  ;;  %s373_s9 = scalar_lea.vmem %s239_s8, 128  ;;  %p378_p11 = scmp.lt.s32.totalorder %s239_s8, %s239_s8 }
  0x3a   :  { %286 = vmatpush3.bf16.msra.mxu0 %v285_v5  ;;  %v294_v14 = vpack.c.bf16 %v68_v13, %v67_v11  ;;  %v248_v15 = vld [vmem:[%s504_s2] ss:$0 sm:$0xff]  ;;  %p374_p10 = scmp.ne.s32.totalorder %s239_s8, %s373_s9  ;;  %p379_p12 = scmp.lt.s32.totalorder %s373_s9, %s373_s9 }
  0x3b   :  { %287 = vmatprep.subr.bf16.mxu0 %v406_v0  ;;  %292 = vmatpush3.bf16.msra.mxu1 %v291_v12  ;;  %v250_v20 = vld [vmem:[%s506_s4] ss:$0 sm:$0xff] }
  0x3c   :  { %293 = vmatprep.subr.bf16.mxu1 %v406_v0  ;;  %p380_p13 = por %p379_p12, %p378_p11 }
  0x3e   :  { %289 = vmatpush3.bf16.msra.mxu0 %v288_v7  ;;  %p381_p0 = pnand %p380_p13, %p374_p10 }
  0x3f   :  { %295 = vmatpush3.bf16.msra.mxu1 %v294_v14 }
  0x41   :  { %271 = vmatmul.mubr.msk.f32.vlgmr.msra.gmra.mrb[0].mxu0 %vm77_vm1, %v70_v8 }
 0x114   :  { %v147_v16 = vpop.f32.mrb[0].mxu0 }
 0x115   :  { %v148_v17 = vadd.f32 %v248_v15, %v147_v16  ;;  %v272_v18 = vpop.f32.mrb[1].mxu0 }
 0x117   :  { %305 = vtanh.f32 %v148_v17 }
 0x121   :  { %v306_v19 = vpop.eup %305 }
 0x122   :  { %282 = vmatmul.mubr.msk.f32.vlgmr.msra.gmra.mrb[0].mxu1 %vm77_vm1, %v306_v19 }
 0x1f5   :  { %v227_v21 = vpop.f32.mrb[0].mxu1 }
 0x1f6   :  { %v228_v22 = vadd.f32 %v250_v20, %v227_v21  ;;  %v283_v23 = vpop.f32.mrb[1].mxu1 }
 0x1f8   :  { %231 = vst [vmem:[#allocation8] sm:$0xff] %v228_v22 }
 0x1f9   :  { %384 = shalt.err (!%p381_p0)
}
 0x1fa   :  { %s385_s11 = scalar_lea.hbm %s507_s5, 128 }
 0x1fb   :  { %p386_p1 = scmp.ne.s32.totalorder %s507_s5, %s385_s11  ;;  %p389_p2 = scmp.lt.u32.totalorder %s385_s11, %s507_s5 }
 0x1fd   :  { %p391_p3 = pnand %p389_p2, %p386_p1 }
 0x1ff   :  { %394 = shalt.err (!%p391_p3)
}
 0x200   :  { %241 = dma.vmem_to_hbm [thread:$0]  %s239_s8, 128, %s507_s5, [#allocation4]  }
 0x201   :  { %399 = dma.done.wait [#allocation4], 128  }
 0x202   :  { %400 = vsyncadd [#allocation4], 4294967168 }
 0x203   :  { %245 = vsyncpa [#allocation3], 1 }
 0x204   :  { %246 = vsyncpa [#allocation6], 1 }
 0x205   :  { %247 = vsyncpa [#allocation4], 1 }

</bundles_post_ra>
